<compile_context>
chip_gen: v7x
topology: tpu7x:2x2x1
jax: 0.10.0
libtpu: 0.0.40
codegen_flags: <defaults>
</compile_context>

<pallas_src>
import functools

import jax
import jax.numpy as jnp
from jax.experimental import pallas as pl
from jax.experimental.pallas import tpu as pltpu


def _hnn_mlp_kernel(xT_ref, w1t_ref, b1_ref, w2t_ref, b2_ref, w3t_ref, b3_ref,
                    yT_ref):
    """Fused 3-layer tanh MLP on a (features, bm) tile; batch on lanes."""
    input_dim = xT_ref.shape[0]

    # ---- Layer 1: tiny K contraction -> VPU FMAs in f32 on un-cast inputs.
    if input_dim <= 8:
        h1_pre = w1t_ref[:, 0:1] * xT_ref[0:1, :]          # (hid, bm) f32
        for d in range(1, input_dim):
            h1_pre = h1_pre + w1t_ref[:, d:d + 1] * xT_ref[d:d + 1, :]
    else:
        # Fallback for non-canonical (large) input_dim: f32 MXU matmul.
        h1_pre = jnp.dot(w1t_ref[...], xT_ref[...],
                         preferred_element_type=jnp.float32)
    h1 = jnp.tanh(h1_pre + b1_ref[...])                    # (hid, bm) f32

    # ---- Layers 2-3: MXU with bf16 operands, f32 accumulate / elementwise.
    h2 = jnp.tanh(
        jnp.dot(w2t_ref[...], h1.astype(w2t_ref.dtype),
                preferred_element_type=jnp.float32)
        + b2_ref[...])                                      # (hid, bm) f32
    yT = (jnp.dot(w3t_ref[...], h2.astype(w3t_ref.dtype),
                  preferred_element_type=jnp.float32)
          + b3_ref[...])                                    # (2,   bm) f32
    yT_ref[...] = yT.astype(yT_ref.dtype)


def _pick_batch_tile(batch, block_batch, per_sample_bytes):
    """Lane-axis batch tile.

    Large (multiple of 128) to amortize the ~0.35 us per-grid-step overhead,
    but capped so per-step VMEM (double-buffered x / y plus (hidden, bm) f32
    intermediates and their bf16 casts) stays under ~12 MiB -- inside v5e's
    16 MiB default scoped VMEM and with ample headroom on v6e/v7x.  No forced
    multi-step split: extra steps only pay on v7x and they appear naturally
    when batch exceeds the cap.
    """
    vmem_budget = 12 * 1024 * 1024
    cap = max(128, ((vmem_budget // max(per_sample_bytes, 1)) // 128) * 128)
    bm = min(block_batch, cap, batch)
    if bm >= batch:
        return batch                      # single full tile (block == array dim)
    return max(128, (bm // 128) * 128)


def hnn_forward(x, params, *, block_batch=16384, mxu_dtype=jnp.bfloat16):
    """Runs the HNN forward pass. Returns (F1, F2), each [batch, 1]."""
    w1, b1, w2, b2, w3, b3 = params
    batch, input_dim = x.shape
    hidden = w1.shape[1]
    out_dim = w3.shape[1]
    assert out_dim == 2, "Output tensor should have shape [batch_size, 2]"

    # Per-batch-element VMEM estimate (bytes) used to cap the lane tile:
    #   x (f32, double-buffered) + y (f32, double-buffered)
    #   + h1/h2 f32 + their bf16 casts feeding the MXU.
    per_sample_bytes = (2 * input_dim * 4 + 2 * out_dim * 4
                        + 2 * hidden * 4 + 2 * hidden * 2)
    bm = _pick_batch_tile(batch, block_batch, per_sample_bytes)
    grid = (pl.cdiv(batch, bm),)

    # Batch-on-lanes operands.  x stays f32 (layer 1 runs on the VPU in f32);
    # only the layer-2/3 weights are bf16 MXU operands.  Weights/biases are
    # resident in VMEM (constant block index, <6 KB total).
    xT = x.T                                               # (in,  batch) f32
    w1t = w1.T.astype(jnp.float32)                         # (hid, in)    f32
    w2t = w2.T.astype(mxu_dtype)                           # (hid, hid)   bf16
    w3t = w3.T.astype(mxu_dtype)                           # (2,   hid)   bf16
    b1t = b1.reshape(hidden, 1).astype(jnp.float32)
    b2t = b2.reshape(hidden, 1).astype(jnp.float32)
    b3t = b3.reshape(out_dim, 1).astype(jnp.float32)

    flops = 2 * batch * (input_dim * hidden + hidden * hidden + hidden * out_dim)
    bytes_accessed = (
        xT.size * 4                              # streamed input (f32)
        + batch * out_dim * 4                    # output (f32)
        + w1t.size * 4 + (w2t.size + w3t.size) * 2
        + (b1t.size + b2t.size + b3t.size) * 4)

    yT = pl.pallas_call(
        _hnn_mlp_kernel,
        out_shape=jax.ShapeDtypeStruct((out_dim, batch), jnp.float32),
        grid_spec=pltpu.PrefetchScalarGridSpec(
            num_scalar_prefetch=0,
            grid=grid,
            in_specs=[
                # x^T: tiled over batch on the lane axis.
                pl.BlockSpec((input_dim, bm), lambda i: (0, i)),
                # weights / biases: resident (constant block index).
                pl.BlockSpec((hidden, input_dim), lambda i: (0, 0)),
                pl.BlockSpec((hidden, 1), lambda i: (0, 0)),
                pl.BlockSpec((hidden, hidden), lambda i: (0, 0)),
                pl.BlockSpec((hidden, 1), lambda i: (0, 0)),
                pl.BlockSpec((out_dim, hidden), lambda i: (0, 0)),
                pl.BlockSpec((out_dim, 1), lambda i: (0, 0)),
            ],
            out_specs=pl.BlockSpec((out_dim, bm), lambda i: (0, i)),
        ),
        compiler_params=pltpu.CompilerParams(
            dimension_semantics=("parallel",)),
        cost_estimate=pl.CostEstimate(
            flops=flops,
            transcendentals=2 * batch * hidden,
            bytes_accessed=bytes_accessed),
    )(xT, w1t, b1t, w2t, b2t, w3t, b3t)

    # HNN.forward: return y.split(1, 1) -> (F1, F2), each [batch, 1].
    f1 = yT[0, :].reshape(batch, 1)
    f2 = yT[1, :].reshape(batch, 1)
    return f1, f2


def init_params(key, input_dim, hidden_dim, out_dim=2):
    """Deterministic PyTorch-Linear-style init (uniform +/-1/sqrt(fan_in))."""
    ks = jax.random.split(key, 6)

    def lin(kw, kb, fan_in, fan_out):
        bound = 1.0 / jnp.sqrt(jnp.float32(fan_in))
        w = jax.random.uniform(kw, (fan_in, fan_out), jnp.float32,
                               -bound, bound)
        b = jax.random.uniform(kb, (1, fan_out), jnp.float32, -bound, bound)
        return w, b

    w1, b1 = lin(ks[0], ks[1], input_dim, hidden_dim)
    w2, b2 = lin(ks[2], ks[3], hidden_dim, hidden_dim)
    w3, b3 = lin(ks[4], ks[5], hidden_dim, out_dim)
    return (w1, b1, w2, b2, w3, b3)


def permutation_tensor(n, assume_canonical_coords=True):
    """JAX equivalent of HNN.permutation_tensor (used by time_derivative)."""
    if assume_canonical_coords:
        m = jnp.eye(n, dtype=jnp.float32)
        return jnp.concatenate([m[n // 2:], -m[:n // 2]], axis=0)
    m = jnp.ones((n, n), jnp.float32) * (1.0 - jnp.eye(n, dtype=jnp.float32))
    m = m.at[::2].multiply(-1.0)
    m = m.at[:, ::2].multiply(-1.0)
    iu = jnp.triu_indices(n, k=1)
    m = m.at[iu].multiply(-1.0)
    return m


def reference_forward(x, params):
    """Pure-JAX f32 reference of the same MLP, for a correctness check."""
    w1, b1, w2, b2, w3, b3 = params
    h1 = jnp.tanh(x @ w1 + b1)
    h2 = jnp.tanh(h1 @ w2 + b2)
    y = h2 @ w3 + b3
    return y[:, 0:1], y[:, 1:2]


if __name__ == "__main__":
    # Canonical HNN setting: phase-space coords (q, p) -> input_dim = 2.
    # batch=256 now runs as ONE lane-dense grid step (no forced split on
    # single-TC chips); large batches tile at up to 16384 samples per step.
    batch, input_dim, hidden = 256, 2, 32

    key = jax.random.PRNGKey(0)
    kx, kp = jax.random.split(key)
    x = jax.random.normal(kx, (batch, input_dim), jnp.float32)
    params = init_params(kp, input_dim, hidden)

    # Symplectic permutation matrix M (constructed, as in __init__).
    _M = permutation_tensor(input_dim)  # noqa: F841

    fwd = jax.jit(functools.partial(hnn_forward, params=params))
    f1, f2 = fwd(x)
    f1 = jax.block_until_ready(f1)
    f2 = jax.block_until_ready(f2)

    r1, r2 = reference_forward(x, params)
    assert f1.shape == (batch, 1) and f2.shape == (batch, 1)
    # Layer 1 is exact f32; layers 2-3 use bf16 MXU operands with f32
    # accumulate / elementwise -> small (~1e-3) absolute error.
    assert jnp.allclose(f1, r1, atol=2e-2), float(jnp.max(jnp.abs(f1 - r1)))
    assert jnp.allclose(f2, r2, atol=2e-2), float(jnp.max(jnp.abs(f2 - r2)))

    # TODO(synk): time_derivative / rk4_time_derivative need autograd through
    # the kernel (torch.autograd.grad); that belongs in a custom_vjp wrapper.
    print("KERNEL_OK")
</pallas_src>

<mosaic_0001>
module attributes {stable_mosaic.version = 11 : i64} {
  func.func @_hnn_mlp_kernel(%arg0: i32, %arg1: memref<2x256xf32, #tpu.memory_space<vmem>>, %arg2: memref<32x2xf32, #tpu.memory_space<vmem>>, %arg3: memref<32x1xf32, #tpu.memory_space<vmem>>, %arg4: memref<32x32xbf16, #tpu.memory_space<vmem>>, %arg5: memref<32x1xf32, #tpu.memory_space<vmem>>, %arg6: memref<2x32xbf16, #tpu.memory_space<vmem>>, %arg7: memref<2x1xf32, #tpu.memory_space<vmem>>, %arg8: memref<2x256xf32, #tpu.memory_space<vmem>>) attributes {dimension_semantics = [#tpu.dimension_semantics<parallel>], iteration_bounds = array<i64: 1>, scalar_prefetch = 0 : i64, scratch_operands = 0 : i64, tpu.core_type = #tpu.core_type<tc>, window_params = [{transform_indices = @transform_0, window_bounds = array<i64: 2, 256>}, {pipeline_mode = #tpu.pipeline_mode<synchronous>, transform_indices = @transform_1, window_bounds = array<i64: 32, 2>}, {pipeline_mode = #tpu.pipeline_mode<synchronous>, transform_indices = @transform_2, window_bounds = array<i64: 32, 1>}, {pipeline_mode = #tpu.pipeline_mode<synchronous>, transform_indices = @transform_3, window_bounds = array<i64: 32, 32>}, {pipeline_mode = #tpu.pipeline_mode<synchronous>, transform_indices = @transform_4, window_bounds = array<i64: 32, 1>}, {pipeline_mode = #tpu.pipeline_mode<synchronous>, transform_indices = @transform_5, window_bounds = array<i64: 2, 32>}, {pipeline_mode = #tpu.pipeline_mode<synchronous>, transform_indices = @transform_6, window_bounds = array<i64: 2, 1>}, {transform_indices = @transform_7, window_bounds = array<i64: 2, 256>}]} {
    %c0 = arith.constant 0 : index
    %c0_0 = arith.constant 0 : index
    %0 = vector.load %arg2[%c0, %c0_0] : memref<32x2xf32, #tpu.memory_space<vmem>>, vector<32x1xf32>
    %c0_1 = arith.constant 0 : index
    %c0_2 = arith.constant 0 : index
    %1 = vector.load %arg1[%c0_1, %c0_2] : memref<2x256xf32, #tpu.memory_space<vmem>>, vector<1x256xf32>
    %2 = vector.broadcast %0 : vector<32x1xf32> to vector<32x256xf32>
    %3 = vector.broadcast %1 : vector<1x256xf32> to vector<32x256xf32>
    %4 = arith.mulf %2, %3 : vector<32x256xf32>
    %c0_3 = arith.constant 0 : index
    %c1 = arith.constant 1 : index
    %5 = vector.load %arg2[%c0_3, %c1] : memref<32x2xf32, #tpu.memory_space<vmem>>, vector<32x1xf32>
    %c1_4 = arith.constant 1 : index
    %c0_5 = arith.constant 0 : index
    %6 = vector.load %arg1[%c1_4, %c0_5] : memref<2x256xf32, #tpu.memory_space<vmem>>, vector<1x256xf32>
    %7 = vector.broadcast %5 : vector<32x1xf32> to vector<32x256xf32>
    %8 = vector.broadcast %6 : vector<1x256xf32> to vector<32x256xf32>
    %9 = arith.mulf %7, %8 : vector<32x256xf32>
    %10 = arith.addf %4, %9 : vector<32x256xf32>
    %c0_6 = arith.constant 0 : index
    %c0_7 = arith.constant 0 : index
    %11 = vector.load %arg3[%c0_6, %c0_7] : memref<32x1xf32, #tpu.memory_space<vmem>>, vector<32x1xf32>
    %12 = vector.broadcast %11 : vector<32x1xf32> to vector<32x256xf32>
    %13 = arith.addf %10, %12 : vector<32x256xf32>
    %14 = math.tanh %13 : vector<32x256xf32>
    %c0_8 = arith.constant 0 : index
    %c0_9 = arith.constant 0 : index
    %15 = vector.load %arg4[%c0_8, %c0_9] : memref<32x32xbf16, #tpu.memory_space<vmem>>, vector<32x32xbf16>
    %16 = arith.truncf %14 : vector<32x256xf32> to vector<32x256xbf16>
    %cst = arith.constant dense<0.000000e+00> : vector<32x256xf32>
    %17 = tpu.matmul %15, %16, %cst {dimension_numbers = #tpu.dot_dimension_numbers<[1], [0], [0], [1], [0, 0, 1, 1], [], []>} : vector<32x32xbf16>, vector<32x256xbf16>, vector<32x256xf32> -> vector<32x256xf32>
    %c0_10 = arith.constant 0 : index
    %c0_11 = arith.constant 0 : index
    %18 = vector.load %arg5[%c0_10, %c0_11] : memref<32x1xf32, #tpu.memory_space<vmem>>, vector<32x1xf32>
    %19 = vector.broadcast %18 : vector<32x1xf32> to vector<32x256xf32>
    %20 = arith.addf %17, %19 : vector<32x256xf32>
    %21 = math.tanh %20 : vector<32x256xf32>
    %c0_12 = arith.constant 0 : index
    %c0_13 = arith.constant 0 : index
    %22 = vector.load %arg6[%c0_12, %c0_13] : memref<2x32xbf16, #tpu.memory_space<vmem>>, vector<2x32xbf16>
    %23 = arith.truncf %21 : vector<32x256xf32> to vector<32x256xbf16>
    %cst_14 = arith.constant dense<0.000000e+00> : vector<2x256xf32>
    %24 = tpu.matmul %22, %23, %cst_14 {dimension_numbers = #tpu.dot_dimension_numbers<[1], [0], [0], [1], [0, 0, 1, 1], [], []>} : vector<2x32xbf16>, vector<32x256xbf16>, vector<2x256xf32> -> vector<2x256xf32>
    %c0_15 = arith.constant 0 : index
    %c0_16 = arith.constant 0 : index
    %25 = vector.load %arg7[%c0_15, %c0_16] : memref<2x1xf32, #tpu.memory_space<vmem>>, vector<2x1xf32>
    %26 = vector.broadcast %25 : vector<2x1xf32> to vector<2x256xf32>
    %27 = arith.addf %24, %26 : vector<2x256xf32>
    %c0_17 = arith.constant 0 : index
    %c0_18 = arith.constant 0 : index
    %28 = vector.load %arg8[%c0_17, %c0_18] : memref<2x256xf32, #tpu.memory_space<vmem>>, vector<2x256xf32>
    tpu.vector_store %arg8[%c0_17, %c0_18], %27 {strides = array<i32>} : memref<2x256xf32, #tpu.memory_space<vmem>>, vector<2x256xf32>,
    return
  }
  func.func @transform_0(%arg0: i32) -> (i32, i32) {
    %c0_i32 = arith.constant 0 : i32
    %c0_i32_0 = arith.constant 0 : i32
    return %c0_i32, %arg0 : i32, i32
  }
  func.func @transform_1(%arg0: i32) -> (i32, i32) {
    %c0_i32 = arith.constant 0 : i32
    %c0_i32_0 = arith.constant 0 : i32
    %c0_i32_1 = arith.constant 0 : i32
    return %c0_i32, %c0_i32_0 : i32, i32
  }
  func.func @transform_2(%arg0: i32) -> (i32, i32) {
    %c0_i32 = arith.constant 0 : i32
    %c0_i32_0 = arith.constant 0 : i32
    %c0_i32_1 = arith.constant 0 : i32
    return %c0_i32, %c0_i32_0 : i32, i32
  }
  func.func @transform_3(%arg0: i32) -> (i32, i32) {
    %c0_i32 = arith.constant 0 : i32
    %c0_i32_0 = arith.constant 0 : i32
    %c0_i32_1 = arith.constant 0 : i32
    return %c0_i32, %c0_i32_0 : i32, i32
  }
  func.func @transform_4(%arg0: i32) -> (i32, i32) {
    %c0_i32 = arith.constant 0 : i32
    %c0_i32_0 = arith.constant 0 : i32
    %c0_i32_1 = arith.constant 0 : i32
    return %c0_i32, %c0_i32_0 : i32, i32
  }
  func.func @transform_5(%arg0: i32) -> (i32, i32) {
    %c0_i32 = arith.constant 0 : i32
    %c0_i32_0 = arith.constant 0 : i32
    %c0_i32_1 = arith.constant 0 : i32
    return %c0_i32, %c0_i32_0 : i32, i32
  }
  func.func @transform_6(%arg0: i32) -> (i32, i32) {
    %c0_i32 = arith.constant 0 : i32
    %c0_i32_0 = arith.constant 0 : i32
    %c0_i32_1 = arith.constant 0 : i32
    return %c0_i32, %c0_i32_0 : i32, i32
  }
  func.func @transform_7(%arg0: i32) -> (i32, i32) {
    %c0_i32 = arith.constant 0 : i32
    %c0_i32_0 = arith.constant 0 : i32
    return %c0_i32, %arg0 : i32, i32
  }
}

</mosaic_0001>

<bundles_post_ra>
// kernel: hnn_forward.1
= control target key start
LH: loop header
LB: loop body
LE: loop exit
PB: predicated region body
PF: predicated region fallthrough
CT: control target
= control target key end

     0   :  { %12 = vsyncpa [#allocation3], 0  ;;  %s635_s0 = inlined_call_operand.vmem [shape: f32[2,256], index: 0, kind: input, shape index: {}]   ;;  %s636_s1 = inlined_call_operand.hbm [shape: f32[32,2], index: 1, kind: input, shape index: {}]   ;;  %s637_s2 = inlined_call_operand.hbm [shape: f32[32,1], index: 2, kind: input, shape index: {}]   ;;  %s638_s3 = inlined_call_operand.vmem [shape: bf16[32,32], index: 3, kind: input, shape index: {}]   ;;  %s639_s4 = inlined_call_operand.hbm [shape: f32[32,1], index: 4, kind: input, shape index: {}]   ;;  %s640_s5 = inlined_call_operand.vmem [shape: bf16[2,32], index: 5, kind: input, shape index: {}]   ;;  %s641_s6 = inlined_call_operand.vmem [shape: f32[2,1], index: 6, kind: input, shape index: {}]   ;;  %s642_s7 = inlined_call_operand.vmem [shape: f32[2,256], index: 7, kind: output, shape index: {}]  }
   0x1   :  { %13 = vsyncpa [#allocation5], 0  ;;  %s505_s24 = smov [#allocation4]   ;;  %s506_s26 = smov [#allocation2]  }
   0x2   :  { %s33_s25 = sshll.u32 %s505_s24, 4  ;;  %s21_s27 = sshll.u32 %s506_s26, 4  ;;  %s34_s25 = int_to_ptr.vmem [resolvable:$true] %s33_s25  ;;  %s552_s27 = int_to_ptr.vmem [resolvable:$true] %s21_s27 }
   0x3   :  { %s435_s30 = scalar_lea.hbm %s637_s2, 512 }
   0x4   :  { %p436_p0 = scmp.ne.s32.totalorder %s637_s2, %s435_s30  ;;  %p439_p1 = scmp.lt.u32.totalorder %s435_s30, %s637_s2 }
   0x6   :  { %p441_p2 = pnand %p439_p1, %p436_p0 }
   0x8   :  { %444 = shalt.err (!%p441_p2)
}
   0x9   :  { %s445_s12 = scalar_lea.vmem %s34_s25, 512  ;;  %p450_p4 = scmp.lt.s32.totalorder %s34_s25, %s34_s25 }
   0xa   :  { %p446_p3 = scmp.ne.s32.totalorder %s34_s25, %s445_s12  ;;  %p451_p5 = scmp.lt.s32.totalorder %s445_s12, %s445_s12 }
   0xc   :  { %p452_p6 = por %p451_p5, %p450_p4 }
   0xe   :  { %p453_p7 = pnand %p452_p6, %p446_p3 }
  0x10   :  { %456 = shalt.err (!%p453_p7)
}
  0x11   :  { %s507_s13 = smov 128   ;;  %s508_s14 = smov 8  }
  0x12   :  { %39 = dma.hbm_to_vmem [thread:$0]  %s637_s2, 512, %s34_s25, [#allocation5], %s507_s13, %s507_s13, %s508_s14  }
  0x13   :  { %s457_s19 = scalar_lea.hbm %s636_s1, 512 }
  0x14   :  { %p458_p8 = scmp.ne.s32.totalorder %s636_s1, %s457_s19  ;;  %p461_p9 = scmp.lt.u32.totalorder %s457_s19, %s636_s1 }
  0x16   :  { %p463_p10 = pnand %p461_p9, %p458_p8 }
  0x18   :  { %466 = shalt.err (!%p463_p10)
}
  0x19   :  { %s467_s24 = scalar_lea.vmem %s552_s27, 512  ;;  %p472_p12 = scmp.lt.s32.totalorder %s552_s27, %s552_s27 }
  0x1a   :  { %p468_p11 = scmp.ne.s32.totalorder %s552_s27, %s467_s24  ;;  %p473_p13 = scmp.lt.s32.totalorder %s467_s24, %s467_s24 }
  0x1c   :  { %p474_p0 = por %p473_p13, %p472_p12 }
  0x1e   :  { %p475_p1 = pnand %p474_p0, %p468_p11 }
  0x20   :  { %478 = shalt.err (!%p475_p1)
}
  0x21   :  { %27 = dma.hbm_to_vmem [thread:$0]  %s636_s1, 512, %s552_s27, [#allocation3], %s507_s13, %s507_s13, %s508_s14  }
  0x22   :  { %s509_s26 = smov [#allocation6]   ;;  %s479_s8 = scalar_lea.hbm %s639_s4, 512 }
  0x23   :  { %s47_s28 = sshll.u32 %s509_s26, 4  ;;  %p480_p2 = scmp.ne.s32.totalorder %s639_s4, %s479_s8  ;;  %s48_s28 = int_to_ptr.vmem [resolvable:$true] %s47_s28 }
  0x24   :  { %p483_p3 = scmp.lt.u32.totalorder %s479_s8, %s639_s4 }
  0x26   :  { %p485_p4 = pnand %p483_p3, %p480_p2 }
  0x28   :  { %488 = shalt.err (!%p485_p4)
}
  0x29   :  { %s489_s15 = scalar_lea.vmem %s48_s28, 512  ;;  %p494_p6 = scmp.lt.s32.totalorder %s48_s28, %s48_s28 }
  0x2a   :  { %p490_p5 = scmp.ne.s32.totalorder %s48_s28, %s489_s15  ;;  %p495_p7 = scmp.lt.s32.totalorder %s489_s15, %s489_s15 }
  0x2c   :  { %p496_p8 = por %p495_p7, %p494_p6 }
  0x2e   :  { %p497_p9 = pnand %p496_p8, %p490_p5 }
  0x30   :  { %500 = shalt.err (!%p497_p9)
}
  0x31   :  { %53 = dma.hbm_to_vmem [thread:$0]  %s639_s4, 512, %s48_s28, [#allocation5], %s507_s13, %s507_s13, %s508_s14  }
  0x32   :  { %501 = dma.done.wait [#allocation3], 512  }
  0x33   :  { %502 = vsyncadd [#allocation3], 4294966784 }
  0x34   :  { %503 = dma.done.wait [#allocation5], 1024  }
  0x35   :  { %504 = vsyncadd [#allocation5], 4294966272  ;;  %v510_v0 = vmov 1   ;;  %v511_v1 = vmov 0   ;;  %v68_v2 = vld [vmem:[#allocation2] sm:$0xff]  ;;  %v69_v3 = vld [vmem:[#allocation2 + $0x8] sm:$0xff]  ;;  %v94_v15 = vlaneseq }
  0x36   :  { %395 = vset.pattern.permute.xlu1 %v510_v0  ;;  %394 = vset.pattern.permute.xlu0 %v511_v1  ;;  %v70_v4 = vld [vmem:[#allocation2 + $0x10] sm:$0xff]  ;;  %v71_v5 = vld [vmem:[#allocation2 + $0x18] sm:$0xff]  ;;  %v158_v6 = vld [vmem:[#allocation4 + $0x8] sm:$0xff]  ;;  %vm239_vm0 = vcmask 261120  }
  0x37   :  { %278 = vmatprep.mubr.bf16.mxu0 %v511_v1  ;;  %353 = vmatprep.mubr.bf16.mxu1 %v511_v1  ;;  %v157_v7 = vld [vmem:[#allocation4] sm:$0xff]  ;;  %v159_v9 = vld [vmem:[#allocation4 + $0x10] sm:$0xff]  ;;  %v160_v11 = vld [vmem:[#allocation4 + $0x18] sm:$0xff]  ;;  %v95_v18 = vshrl.u32 %v94_v15, 7 }
  0x38   :  { %115 = vperm.xlu1 %395, %v68_v2   ;;  %75 = vperm.xlu0 %394, %v68_v2   ;;  %v205_v8 = vld [vmem:[#allocation6] sm:$0xff]  ;;  %v207_v10 = vld [vmem:[#allocation6 + $0x10] sm:$0xff]  ;;  %v206_v13 = vld [vmem:[#allocation6 + $0x8] sm:$0xff] }
  0x39   :  { %v312_v12 = vld [vmem:[%s641_s6] sm:$0x3]  ;;  %v208_v14 = vld [vmem:[#allocation6 + $0x18] sm:$0xff]  ;;  %v96_v21 = vsub.s32 0, %v95_v18  ;;  %v100_v22 = vsub.s32 1, %v95_v18 }
  0x3a   :  { %v380_v23 = vld [vmem:[%s635_s0 + $0x1] ss:$2 sm:$0x3]  ;;  %v72_v24 = vld [vmem:[%s635_s0] ss:$2 sm:$0x3] }
  0x3b   :  { %v134_v26 = vrot.slane %v380_v23, %v96_v21  ;;  %v138_v27 = vrot.slane %v380_v23, %v100_v22  ;;  %v97_v28 = vrot.slane %v72_v24, %v96_v21  ;;  %v101_v29 = vrot.slane %v72_v24, %v100_v22  ;;  %v401_v18 = vld [vmem:[%s638_s3] sm:$0xff]  }
  0x3c   :  { %119 = vperm.xlu1 %395, %v69_v3   ;;  %397 = vset.pattern.permute.xlu0 %v510_v0 }
  0x3d   :  { %123 = vperm.xlu0 %397, %v70_v4  }
  0x40   :  { %396 = vset.pattern.permute.xlu1 %v511_v1 }
  0x41   :  { %90 = vperm.xlu1 %396, %v71_v5   ;;  %398 = vset.pattern.permute.xlu0 %v511_v1 }
  0x42   :  { %80 = vperm.xlu0 %398, %v69_v3  }
  0x45   :  { %399 = vset.pattern.permute.xlu1 %v510_v0 }
  0x46   :  { %127 = vperm.xlu1 %399, %v71_v5   ;;  %85 = vperm.xlu0 %398, %v70_v4  }
  0x4a   :  { %400 = vset.pattern.permute.xlu1 %v511_v1  ;;  %168 = vperm.xlu0 %398, %v158_v6  }
  0x4b   :  { %163 = vperm.xlu1 %400, %v157_v7  }
  0x4e   :  { %211 = vperm.xlu0 %398, %v205_v8  }
  0x4f   :  { %173 = vperm.xlu1 %400, %v159_v9  }
  0x52   :  { %221 = vperm.xlu0 %398, %v207_v10  }
  0x53   :  { %178 = vperm.xlu1 %400, %v160_v11  }
  0x56   :  { %315 = vperm.xlu0 %398, %v312_v12  }
  0x57   :  { %216 = vperm.xlu1 %400, %v206_v13  }
  0x5b   :  { %226 = vperm.xlu1 %400, %v208_v14  }
  0xb7   :  { %v116_v16 = vpop.permute.xlu1 %115  ;;  %v76_v17 = vpop.permute.xlu0 %75 }
  0xb8   :  { %v141_v33 = vmul.f32 %v134_v26, %v116_v16  ;;  %v142_v34 = vmul.f32 %v138_v27, %v116_v16  ;;  %v104_v35 = vmul.f32 %v97_v28, %v76_v17  ;;  %v105_v36 = vmul.f32 %v101_v29, %v76_v17 }
  0xba   :  { %v149_v45 = vadd.f32 %v141_v33, %v104_v35  ;;  %v150_v46 = vadd.f32 %v142_v34, %v105_v36 }
  0xbb   :  { %v120_v19 = vpop.permute.xlu1 %119 }
  0xbc   :  { %v124_v20 = vpop.permute.xlu0 %123  ;;  %v143_v39 = vmul.f32 %v134_v26, %v120_v19  ;;  %v144_v40 = vmul.f32 %v138_v27, %v120_v19  ;;  %v402_v19 = vld [vmem:[%s638_s3 + $0x8] sm:$0xff]  }
  0xbd   :  { %v145_v51 = vmul.f32 %v134_v26, %v124_v20  ;;  %v146_v54 = vmul.f32 %v138_v27, %v124_v20 }
  0xc0   :  { %v91_v25 = vpop.permute.xlu1 %90 }
  0xc1   :  { %v81_v30 = vpop.permute.xlu0 %80  ;;  %v110_v60 = vmul.f32 %v97_v28, %v91_v25  ;;  %v111_v61 = vmul.f32 %v101_v29, %v91_v25 }
  0xc2   :  { %v106_v31 = vmul.f32 %v97_v28, %v81_v30  ;;  %v107_v32 = vmul.f32 %v101_v29, %v81_v30 }
  0xc4   :  { %v151_v41 = vadd.f32 %v143_v39, %v106_v31  ;;  %v152_v42 = vadd.f32 %v144_v40, %v107_v32 }
  0xc5   :  { %v128_v37 = vpop.permute.xlu1 %127  ;;  %v86_v38 = vpop.permute.xlu0 %85 }
  0xc6   :  { %v108_v43 = vmul.f32 %v97_v28, %v86_v38  ;;  %v109_v47 = vmul.f32 %v101_v29, %v86_v38  ;;  %v147_v55 = vmul.f32 %v134_v26, %v128_v37  ;;  %v148_v56 = vmul.f32 %v138_v27, %v128_v37 }
  0xc8   :  { %v153_v57 = vadd.f32 %v145_v51, %v108_v43  ;;  %v154_v59 = vadd.f32 %v146_v54, %v109_v47  ;;  %v155_v0 = vadd.f32 %v147_v55, %v110_v60  ;;  %v156_v2 = vadd.f32 %v148_v56, %v111_v61  ;;  %v307_v51 = vld [vmem:[%s640_s5] sm:$0x1] }
  0xc9   :  { %v169_v44 = vpop.permute.xlu0 %168 }
  0xca   :  { %v183_v48 = vadd.f32 %v169_v44, %v151_v41  ;;  %v184_v49 = vadd.f32 %v169_v44, %v152_v42  ;;  %v164_v50 = vpop.permute.xlu1 %163 }
  0xcb   :  { %v181_v52 = vadd.f32 %v164_v50, %v149_v45  ;;  %v182_v53 = vadd.f32 %v164_v50, %v150_v46 }
  0xcc   :  { %403 = vtanh.f32 %v183_v48 }
  0xcd   :  { %405 = vtanh.f32 %v184_v49  ;;  %v212_v20 = vpop.permute.xlu0 %211 }
  0xce   :  { %407 = vtanh.f32 %v181_v52  ;;  %v174_v58 = vpop.permute.xlu1 %173 }
  0xcf   :  { %409 = vtanh.f32 %v182_v53  ;;  %v185_v62 = vadd.f32 %v174_v58, %v153_v57  ;;  %v186_v63 = vadd.f32 %v174_v58, %v154_v59 }
  0xd1   :  { %411 = vtanh.f32 %v185_v62 }
  0xd2   :  { %v179_v3 = vpop.permute.xlu1 %178  ;;  %413 = vtanh.f32 %v186_v63 }
  0xd3   :  { %v187_v4 = vadd.f32 %v179_v3, %v155_v0  ;;  %v188_v5 = vadd.f32 %v179_v3, %v156_v2 }
  0xd5   :  { %415 = vtanh.f32 %v187_v4 }
  0xd6   :  { %v404_v6 = vpop.eup %403  ;;  %417 = vtanh.f32 %v188_v5  ;;  %v217_v24 = vpop.permute.xlu1 %216 }
  0xd7   :  { %v406_v7 = vpop.eup %405 }
  0xd8   :  { %v408_v8 = vpop.eup %407 }
  0xd9   :  { %v410_v9 = vpop.eup %409  ;;  %v201_v10 = vpack.c.bf16 %v404_v6, %v408_v8 }
  0xda   :  { %v202_v11 = vpack.c.bf16 %v406_v7, %v410_v9  ;;  %v227_v33 = vpop.permute.xlu1 %226 }
  0xdb   :  { %v412_v12 = vpop.eup %411 }
  0xdc   :  { %246 = vmatprep.subr.bf16.mxu0 %v202_v11  ;;  %v414_v13 = vpop.eup %413 }
  0xdd   :  { %247 = vmatpush1.bf16.msra.mxu0 %v201_v10 }
  0xdf   :  { %v416_v14 = vpop.eup %415 }
  0xe0   :  { %v418_v15 = vpop.eup %417  ;;  %v203_v16 = vpack.c.bf16 %v416_v14, %v412_v12 }
  0xe1   :  { %v204_v17 = vpack.c.bf16 %v418_v15, %v414_v13 }
  0xe3   :  { %248 = vmatprep.subr.bf16.mxu0 %v204_v17 }
  0xe4   :  { %249 = vmatpush1.bf16.msra.mxu0 %v203_v16 }
  0xe7   :  { %383 = vmatmul.mubr.msk.bf16.vlgmr.msra.gmra.mrb[0].mxu0 %vm239_vm0, %v401_v18 }
  0xe8   :  { %288 = vmatprep.mubr.bf16.mxu0 %v511_v1  ;;  %v222_v1 = vpop.permute.xlu0 %221 }
  0xec   :  { %v316_v52 = vpop.permute.xlu0 %315 }
  0xef   :  { %384 = vmatmul.mubr.msk.bf16.gmra.mrb[4].mxu0 %vm239_vm0, %v402_v19 }
 0x1ba   :  { %v280_v21 = vpop.f32.mrb[0].mxu0 }
 0x1bb   :  { %v281_v22 = vadd.f32 %v280_v21, %v212_v20  ;;  %v282_v23 = vpop.f32.mrb[1].mxu0 }
 0x1bc   :  { %v283_v25 = vadd.f32 %v282_v23, %v212_v20  ;;  %v284_v26 = vpop.f32.mrb[2].mxu0 }
 0x1bd   :  { %419 = vtanh.f32 %v281_v22  ;;  %v285_v27 = vadd.f32 %v284_v26, %v217_v24  ;;  %v286_v28 = vpop.f32.mrb[3].mxu0 }
 0x1be   :  { %421 = vtanh.f32 %v283_v25  ;;  %v287_v29 = vadd.f32 %v286_v28, %v217_v24 }
 0x1bf   :  { %423 = vtanh.f32 %v285_v27 }
 0x1c0   :  { %425 = vtanh.f32 %v287_v29 }
 0x1c2   :  { %v290_v30 = vpop.f32.mrb[4].mxu0 }
 0x1c3   :  { %v291_v31 = vadd.f32 %v290_v30, %v222_v1  ;;  %v292_v32 = vpop.f32.mrb[5].mxu0 }
 0x1c4   :  { %v293_v34 = vadd.f32 %v292_v32, %v222_v1  ;;  %v294_v35 = vpop.f32.mrb[6].mxu0 }
 0x1c5   :  { %427 = vtanh.f32 %v291_v31  ;;  %v295_v36 = vadd.f32 %v294_v35, %v227_v33  ;;  %v296_v37 = vpop.f32.mrb[7].mxu0 }
 0x1c6   :  { %429 = vtanh.f32 %v293_v34  ;;  %v297_v38 = vadd.f32 %v296_v37, %v227_v33 }
 0x1c7   :  { %v420_v39 = vpop.eup %419  ;;  %431 = vtanh.f32 %v295_v36 }
 0x1c8   :  { %v422_v40 = vpop.eup %421  ;;  %433 = vtanh.f32 %v297_v38 }
 0x1c9   :  { %v424_v41 = vpop.eup %423 }
 0x1ca   :  { %v426_v42 = vpop.eup %425  ;;  %v308_v43 = vpack.c.bf16 %v424_v41, %v420_v39 }
 0x1cb   :  { %v309_v44 = vpack.c.bf16 %v426_v42, %v422_v40 }
 0x1cd   :  { %321 = vmatprep.subr.bf16.mxu1 %v309_v44 }
 0x1ce   :  { %322 = vmatpush1.bf16.msra.mxu1 %v308_v43 }
 0x1cf   :  { %v428_v45 = vpop.eup %427 }
 0x1d0   :  { %v430_v46 = vpop.eup %429 }
 0x1d1   :  { %v432_v47 = vpop.eup %431 }
 0x1d2   :  { %v434_v48 = vpop.eup %433  ;;  %v310_v49 = vpack.c.bf16 %v432_v47, %v428_v45 }
 0x1d3   :  { %v311_v50 = vpack.c.bf16 %v434_v48, %v430_v46 }
 0x1d5   :  { %323 = vmatprep.subr.bf16.mxu1 %v311_v50 }
 0x1d6   :  { %324 = vmatpush1.bf16.msra.mxu1 %v310_v49 }
 0x1d9   :  { %385 = vmatmul.mubr.msk.bf16.vlgmr.msra.gmra.mrb[0].mxu1 %vm239_vm0, %v307_v51 }
 0x2ac   :  { %v355_v53 = vpop.f32.mrb[0].mxu1 }
 0x2ad   :  { %v356_v54 = vadd.f32 %v355_v53, %v316_v52  ;;  %v357_v55 = vpop.f32.mrb[1].mxu1 }
 0x2ae   :  { %v358_v56 = vadd.f32 %v357_v55, %v316_v52  ;;  %v359_v57 = vpop.f32.mrb[2].mxu1 }
 0x2af   :  { %v360_v58 = vpop.f32.mrb[3].mxu1 }
 0x2b0   :  { %v364_v59 = vcombine.low %v356_v54, %v358_v56 }
 0x2b2   :  { %386 = vst.sshfl [vmem:[%s642_s7] sm:$0x33 pattern:$0x76325410] %v364_v59 }
 0x2b3   :  { %378 = vsyncpa [#allocation3], 1 }
 0x2b4   :  { %379 = vsyncpa [#allocation5], 1 }

</bundles_post_ra>
